<compile_context>
chip_gen: v7x
topology: tpu7x:2x2x1
jax: 0.10.0
libtpu: 0.0.40
codegen_flags: <defaults>
</compile_context>

<pallas_src>
import jax
import jax.numpy as jnp
from jax import lax
from jax.experimental import pallas as pl
from jax.experimental.pallas import tpu as pltpu

JITTER = 1e-8
DIST_FLOOR = 1e-20                 # torch: dist[dist == 0] = 1e-20, det clamp min


def _hw_config():
    # v5e / v6e: 128 MiB physical VMEM -> 1024 tiles, 64 MiB scoped limit.
    # v7x (64 MiB VMEM) or unknown: stay at 512 / 32 MiB (safe everywhere, kernels are mem-bound).
    tile_cap, vmem_limit = 512, 32 * 1024 * 1024
    try:
        info = pltpu.get_tpu_info()
        vmem_bytes = getattr(info, "vmem_capacity_bytes", None)
        if vmem_bytes is not None and vmem_bytes >= 100 * 1024 * 1024:
            tile_cap, vmem_limit = 1024, 64 * 1024 * 1024
    except Exception:
        pass
    return tile_cap, vmem_limit


TILE_CAP, VMEM_LIMIT = _hw_config()


def _tile(n):
    # Full extent if it fits (always a legal block), else an (8,128)-aligned tile.
    return n if n <= TILE_CAP else TILE_CAP


def _smem_spec():
    return pl.BlockSpec(memory_space=pltpu.MemorySpace.SMEM)


# ----------------------------------------------------------------------------
# Pallas kernel bodies
# ----------------------------------------------------------------------------

def _local_rbf_body(scale_ref, var_ref, a_ref, b_ref, o_ref):
    # grid = (nj, D, ni); scale/var: SMEM (D,); a (1, tm, 1); b (1, 1, tn); o (1, tm, tn)
    d = pl.program_id(1)
    diff = a_ref[0] - b_ref[0]                        # (tm, 1) - (1, tn) -> (tm, tn)
    dist = jnp.maximum(diff * diff, DIST_FLOOR)       # == where(dist == 0, 1e-20, dist); dist >= 0
    o_ref[0] = var_ref[d] * jnp.exp(scale_ref[d] * dist)


def _latent_l_body(alpha_ref, kstarT_ref, o_ref):
    # alpha (D, M, 1), kstarT (D, M, tn) -> o (D, tn) = exp(sum_m alpha[d,m] * kstarT[d,m,:])
    # VPU lane-broadcast multiply + sublane reduce (M tiny); no 1-row MXU dots.
    d_total = o_ref.shape[0]
    for d in range(d_total):                          # static unroll, D is tiny
        prod = alpha_ref[d] * kstarT_ref[d]           # (M, 1) * (M, tn) -> (M, tn)
        o_ref[d:d + 1, :] = jnp.exp(jnp.sum(prod, axis=0, keepdims=True))


def _residual_fused_body(s_ref, xa_ref, xb_ref, ks_ref, v_ref, o_ref):
    # k_post tile = k_star_star (computed in-register) - k_star @ v.
    # s: SMEM (2,) = [scale, var]; xa (tm, 1); xb (1, tn); ks (tm, M); v (M, tn); o (tm, tn)
    diff = xa_ref[...] - xb_ref[...]
    dist = jnp.maximum(diff * diff, DIST_FLOOR)
    kss = s_ref[1] * jnp.exp(s_ref[0] * dist)
    o_ref[...] = kss - jnp.dot(ks_ref[...], v_ref[...], preferred_element_type=jnp.float32)


def _global_body(sc_ref, x1_ref, x2t_ref, l1_ref, l2t_ref, l1sq_ref, l2sqt_ref, o_ref):
    # sc: SMEM (2,) = [gstd^4 * 2^D, diag_add]; x1/l1/l1sq: (tm, D); x2t/l2t/l2sqt: (D, tn)
    d_total = x1_ref.shape[1]
    g = sc_ref[0]
    prod = None
    scaled = None
    for d in range(d_total):                          # static unroll over input dims
        lsq = l1sq_ref[:, d:d + 1] + l2sqt_ref[d:d + 1, :]        # (tm, tn)
        inv = pl.reciprocal(lsq, approx=True)                     # EUP, off the VALU slots
        term = (l1_ref[:, d:d + 1] * l2t_ref[d:d + 1, :]) * inv   # 2* folded into g
        prod = (g * term) if prod is None else (prod * term)
        diff = x1_ref[:, d:d + 1] - x2t_ref[d:d + 1, :]
        sq = (diff * diff) * inv
        scaled = sq if scaled is None else scaled + sq
    # single sqrt of gstd^4 * 2^D * prod(l1*l2/lsq) == gstd^2 * prod(sqrt(2*l1*l2/lsq))
    k = jnp.sqrt(prod) * jnp.exp(-scaled)

    # Fused noise-diagonal add: diagonal elements only live in tiles with i == j
    # (square tiling, tm == tn in the training forward).  diag_add = 0 -> exact no-op.
    i = pl.program_id(0)
    j = pl.program_id(1)

    @pl.when(i == j)
    def _():
        r = lax.broadcasted_iota(jnp.int32, k.shape, 0)
        c = lax.broadcasted_iota(jnp.int32, k.shape, 1)
        o_ref[...] = k + jnp.where(r == c, sc_ref[1], jnp.float32(0.0))

    @pl.when(i != j)
    def _():
        o_ref[...] = k


# ----------------------------------------------------------------------------
# Pallas wrappers
# ----------------------------------------------------------------------------

def local_rbf_batched(A, B, scale, var):
    """out[d] = var[d] * exp(scale[d] * max((A[:,d,None]-B[:,d,None].T)^2, 1e-20)), (D, Na, Nb).

    scale/var are the per-dim scalars precomputed in the caller (-0.5/ls^2, std^2), kept in SMEM.
    Only used for the small X_bar-row kernels after the last-dim-only change, so the column (Nb)
    axis is the large one -> it is the outermost (megacore) grid axis, D sits in the middle.
    """
    Na, D = A.shape
    Nb = B.shape[0]
    a_cols = A.T.reshape(D, Na, 1).astype(jnp.float32)
    b_rows = B.T.reshape(D, 1, Nb).astype(jnp.float32)
    tm, tn = _tile(Na), _tile(Nb)
    grid = (pl.cdiv(Nb, tn), D, pl.cdiv(Na, tm))
    return pl.pallas_call(
        _local_rbf_body,
        out_shape=jax.ShapeDtypeStruct((D, Na, Nb), jnp.float32),
        grid=grid,
        in_specs=[
            _smem_spec(),                                            # scale (D,)
            _smem_spec(),                                            # var   (D,)
            pl.BlockSpec((1, tm, 1), lambda j, d, i: (d, i, 0)),
            pl.BlockSpec((1, 1, tn), lambda j, d, i: (d, 0, j)),
        ],
        out_specs=pl.BlockSpec((1, tm, tn), lambda j, d, i: (d, i, j)),
        compiler_params=pltpu.CompilerParams(
            dimension_semantics=("parallel", "parallel", "parallel"),
            vmem_limit_bytes=VMEM_LIMIT),
    )(scale.astype(jnp.float32), var.astype(jnp.float32), a_cols, b_rows)


def latent_lengthscales(alpha_dm1, k_starT):
    """l[d, :] = exp(sum_m alpha[d, m] * k_starT[d, m, :]); tiled over N, shape (D, N)."""
    D, M, _ = alpha_dm1.shape
    N = k_starT.shape[2]
    tn = _tile(N)
    return pl.pallas_call(
        _latent_l_body,
        out_shape=jax.ShapeDtypeStruct((D, N), jnp.float32),
        grid=(pl.cdiv(N, tn),),
        in_specs=[
            pl.BlockSpec((D, M, 1), lambda j: (0, 0, 0)),
            pl.BlockSpec((D, M, tn), lambda j: (0, 0, j)),
        ],
        out_specs=pl.BlockSpec((D, tn), lambda j: (0, j)),
        compiler_params=pltpu.CompilerParams(
            dimension_semantics=("parallel",),
            vmem_limit_bytes=VMEM_LIMIT),
    )(alpha_dm1.astype(jnp.float32), k_starT.astype(jnp.float32))


def residual_fused(x_col, k_star, v, scale, var):
    """k_post = k_star_star - k_star @ v for ONE input dim, with k_star_star generated in-register."""
    N, M = k_star.shape
    tm = _tile(N)
    tn = tm
    grid = (pl.cdiv(N, tm), pl.cdiv(N, tn))
    s = jnp.stack([scale, var]).astype(jnp.float32)
    xa = x_col.reshape(N, 1).astype(jnp.float32)
    xb = x_col.reshape(1, N).astype(jnp.float32)
    return pl.pallas_call(
        _residual_fused_body,
        out_shape=jax.ShapeDtypeStruct((N, N), jnp.float32),
        grid=grid,
        in_specs=[
            _smem_spec(),                                        # [scale, var]
            pl.BlockSpec((tm, 1), lambda i, j: (i, 0)),
            pl.BlockSpec((1, tn), lambda i, j: (0, j)),
            pl.BlockSpec((tm, M), lambda i, j: (i, 0)),          # full-M contraction (M tiny)
            pl.BlockSpec((M, tn), lambda i, j: (0, j)),
        ],
        out_specs=pl.BlockSpec((tm, tn), lambda i, j: (i, j)),
        compiler_params=pltpu.CompilerParams(
            dimension_semantics=("parallel", "parallel"),
            vmem_limit_bytes=VMEM_LIMIT),
    )(s, xa, xb, k_star.astype(jnp.float32), v.astype(jnp.float32))


def global_kernel(X1, X2, L1, L2, gstd, diag_add=0.0):
    """Nonstationary Gibbs kernel, tiled over the (N1, N2) output; optional fused diagonal add."""
    N1, D = X1.shape
    N2 = X2.shape[0]
    tm, tn = _tile(N1), _tile(N2)
    grid = (pl.cdiv(N1, tm), pl.cdiv(N2, tn))
    X1 = X1.astype(jnp.float32)
    X2 = X2.astype(jnp.float32)
    L1 = L1.astype(jnp.float32)
    L2 = L2.astype(jnp.float32)
    gvar = gstd.astype(jnp.float32) ** 2
    # gstd^2 * sqrt(prod(2*l1*l2/lsq)) == sqrt(gstd^4 * 2^D * prod(l1*l2/lsq)): one SMEM constant.
    s0 = gvar * gvar * jnp.float32(2.0 ** D)
    sc = jnp.stack([s0, jnp.asarray(diag_add, dtype=jnp.float32)]).astype(jnp.float32)
    return pl.pallas_call(
        _global_body,
        out_shape=jax.ShapeDtypeStruct((N1, N2), jnp.float32),
        grid=grid,
        in_specs=[
            _smem_spec(),                                        # [gstd^4*2^D, diag_add]
            pl.BlockSpec((tm, D), lambda i, j: (i, 0)),          # X1 rows
            pl.BlockSpec((D, tn), lambda i, j: (0, j)),          # X2^T cols
            pl.BlockSpec((tm, D), lambda i, j: (i, 0)),          # L1
            pl.BlockSpec((D, tn), lambda i, j: (0, j)),          # L2^T
            pl.BlockSpec((tm, D), lambda i, j: (i, 0)),          # L1^2 (precomputed)
            pl.BlockSpec((D, tn), lambda i, j: (0, j)),          # (L2^2)^T (precomputed)
        ],
        out_specs=pl.BlockSpec((tm, tn), lambda i, j: (i, j)),
        compiler_params=pltpu.CompilerParams(
            dimension_semantics=("parallel", "parallel"),
            vmem_limit_bytes=VMEM_LIMIT),
    )(sc, X1, X2.T, L1, L2.T, L1 * L1, (L2 * L2).T)


# ----------------------------------------------------------------------------
# NSGP forward (training mode) in JAX, using the Pallas kernels above
# ----------------------------------------------------------------------------

def init_params(key, input_dim, num_latent_points):
    # NSGP.initialize_params: all params ~ Normal(0, 1) (deterministic seed here).
    ks = jax.random.split(key, 6)
    return {
        "local_gp_ls": jax.random.normal(ks[0], (input_dim,), jnp.float32),
        "local_gp_std": jax.random.normal(ks[1], (input_dim,), jnp.float32),
        "local_gp_noise_std": jax.random.normal(ks[2], (input_dim,), jnp.float32),
        "local_ls": jax.random.normal(ks[3], (num_latent_points, input_dim), jnp.float32),
        "global_gp_std": jax.random.normal(ks[4], (1,), jnp.float32),
        "global_gp_noise_std": jax.random.normal(ks[5], (1,), jnp.float32),
    }


def compute_local_quantities(X, X_bar, params):
    """Equivalent of NSGP.get_LS over all dims (training mode).
    Returns (L_all (N, D), B_last (1, 1)); B_last is the log-det of the LAST dim's posterior
    covariance (the torch GlobalKernel returns the B of the final loop iteration), so the
    expensive O(N^2)/O(N^3) posterior work is done for d = D-1 ONLY."""
    N, D = X.shape
    M = X_bar.shape[0]
    ls = params["local_gp_ls"].astype(jnp.float32)
    std = params["local_gp_std"].astype(jnp.float32)
    noise = params["local_gp_noise_std"].astype(jnp.float32)
    scale = -0.5 / (ls * ls)                                           # (D,)
    var = std * std                                                    # (D,)

    # Small D-batched kernels on the X_bar rows (M is tiny).
    k_bar = local_rbf_batched(X_bar, X_bar, scale, var)                # (D, M, M)
    k_starT = local_rbf_batched(X_bar, X, scale, var)                  # (D, M, N) == per-dim k_star.T

    # TODO(synk): the (noise^2+jitter)*I add could be fused into the RBF kernel via a diagonal-tile
    # mask, but it is an O(D*M^2) pass with M tiny, so it stays in plain JAX.
    k_bar = k_bar + ((noise * noise) + JITTER)[:, None, None] * jnp.eye(M, dtype=jnp.float32)

    # TODO(synk): cholesky / cho_solve / det have no clean Pallas equivalent; plain (batched) JAX.
    c = jnp.linalg.cholesky(k_bar)                                     # (D, M, M)
    target = jnp.log(jnp.abs(params["local_ls"].astype(jnp.float32))).T[:, :, None]   # (D, M, 1)
    alpha = jax.vmap(lambda cc, bb: jax.scipy.linalg.cho_solve((cc, True), bb))(c, target)  # (D, M, 1)

    L_all = latent_lengthscales(alpha, k_starT).T                      # (N, D)

    # Posterior residual + det: LAST dim only (k_star_star fused into the residual kernel).
    dl = D - 1
    v_last = jax.scipy.linalg.cho_solve((c[dl], True), k_starT[dl])    # (M, N)
    k_star_last = k_starT[dl].T                                        # (N, M), kernel is symmetric
    k_post = residual_fused(X[:, dl], k_star_last, v_last, scale[dl], var[dl])  # (N, N)
    # TODO(synk): torch uses det + clamp(1e-20); f32 det under/overflows for large N — a
    # Cholesky/slogdet log-det would be sturdier but changes the torch semantics.
    det = jnp.maximum(jnp.linalg.det(k_post), DIST_FLOOR)
    B_last = jnp.log(det).reshape(1, 1)
    return L_all, B_last


def nsgp_forward(X, y, X_bar, params):
    N, D = X.shape
    y_c = y - jnp.mean(y)                                              # y - raw_mean

    L_all, B_last = compute_local_quantities(X, X_bar, params)

    gnoise = params["global_gp_noise_std"][0]
    diag_add = gnoise * gnoise + JITTER                                # fused into the kernel
    K = global_kernel(X, X, L_all, L_all, params["global_gp_std"][0], diag_add=diag_add)

    L_chol = jnp.linalg.cholesky(K)
    alpha = jax.scipy.linalg.cho_solve((L_chol, True), y_c)
    Apart1 = y_c.T @ alpha                                             # (1, 1)
    Apart2 = jnp.sum(jnp.log(jnp.diagonal(L_chol)))
    A = 0.5 * (Apart1 + Apart2)[0, 0]
    return (A + B_last) / (N * D)                                      # matches X.nelement()


# Pure-JAX reference of the global kernel (sanity check of the Pallas path).
def global_kernel_ref(X1, X2, L1, L2, gstd):
    suffix, scaled = None, None
    for d in range(X1.shape[1]):
        l1 = L1[:, d:d + 1]
        l2 = L2[:, d:d + 1]
        lsq = l1 ** 2 + (l2.T) ** 2
        s = jnp.sqrt(2.0 * (l1 @ l2.T) / lsq)
        suffix = s if suffix is None else suffix * s
        dist = (X1[:, None, d] - X2[None, :, d]) ** 2
        sd = dist / lsq
        scaled = sd if scaled is None else scaled + sd
    return (gstd ** 2) * suffix * jnp.exp(-scaled)


if __name__ == "__main__":
    key = jax.random.PRNGKey(0)
    k_x, k_y, k_xbar, k_params, k_v = jax.random.split(key, 5)

    N, D, M = 32, 3, 8          # n points, input_dim, num_latent_points
    X = jax.random.normal(k_x, (N, D), jnp.float32)
    y = jax.random.normal(k_y, (N, 1), jnp.float32)
    X_bar = jax.random.normal(k_xbar, (M, D), jnp.float32)
    params = init_params(k_params, D, M)

    out = jax.block_until_ready(nsgp_forward(X, y, X_bar, params))
    assert out.shape == (1, 1)

    ls, std = params["local_gp_ls"], params["local_gp_std"]
    scale_all = -0.5 / (ls * ls)
    var_all = std * std

    # Sanity 1: batched local RBF vs pure-JAX reference.
    k_pl = jax.block_until_ready(local_rbf_batched(X, X_bar, scale_all, var_all))      # (D, N, M)
    d2 = jnp.maximum((X[:, None, :] - X_bar[None, :, :]) ** 2, DIST_FLOOR)              # (N, M, D)
    k_ref = jnp.transpose((std ** 2) * jnp.exp(-0.5 * d2 / (ls ** 2)), (2, 0, 1))
    assert jnp.allclose(k_pl, k_ref, rtol=1e-3, atol=1e-4), "local kernel mismatch"

    # Sanity 2: fused k_star_star + residual kernel vs pure-JAX reference (last dim only).
    dl = D - 1
    v_rand = jax.random.normal(k_v, (M, N), jnp.float32)
    k_post_pl = jax.block_until_ready(
        residual_fused(X[:, dl], k_pl[dl], v_rand, scale_all[dl], var_all[dl]))
    dxx = jnp.maximum((X[:, dl:dl + 1] - X[:, dl][None, :]) ** 2, DIST_FLOOR)
    kss_ref = var_all[dl] * jnp.exp(scale_all[dl] * dxx)
    k_post_ref = kss_ref - jnp.dot(k_pl[dl], v_rand, precision=lax.Precision.HIGHEST)
    assert jnp.allclose(k_post_pl, k_post_ref, rtol=5e-3, atol=1e-3), "residual kernel mismatch"

    # Sanity 3: tiled global Gibbs kernel (approx reciprocal, fused zero diag add) vs reference.
    L_all, _ = compute_local_quantities(X, X_bar, params)
    gstd = params["global_gp_std"][0]
    K_pl = jax.block_until_ready(global_kernel(X, X, L_all, L_all, gstd, diag_add=0.0))
    K_ref = global_kernel_ref(X, X, L_all, L_all, gstd)
    assert jnp.allclose(K_pl, K_ref, rtol=2e-2, atol=1e-3), "global kernel mismatch"

    print("KERNEL_OK")
</pallas_src>

<mosaic_0001>
module attributes {stable_mosaic.version = 11 : i64} {
  func.func @_local_rbf_body(%arg0: i32, %arg1: i32, %arg2: i32, %arg3: memref<3xf32, #tpu.memory_space<smem>>, %arg4: memref<3xf32, #tpu.memory_space<smem>>, %arg5: memref<1x8x1xf32, #tpu.memory_space<vmem>>, %arg6: memref<1x1x8xf32, #tpu.memory_space<vmem>>, %arg7: memref<1x8x8xf32, #tpu.memory_space<vmem>>) attributes {dimension_semantics = [#tpu.dimension_semantics<parallel>, #tpu.dimension_semantics<parallel>, #tpu.dimension_semantics<parallel>], iteration_bounds = array<i64: 1, 3, 1>, scalar_prefetch = 0 : i64, scratch_operands = 0 : i64, tpu.core_type = #tpu.core_type<tc>, window_params = [{transform_indices = @transform_0, window_bounds = array<i64: 3>}, {transform_indices = @transform_1, window_bounds = array<i64: 3>}, {transform_indices = @transform_2, window_bounds = array<i64: 1, 8, 1>}, {transform_indices = @transform_3, window_bounds = array<i64: 1, 1, 8>}, {transform_indices = @transform_4, window_bounds = array<i64: 1, 8, 8>}]} {
    %c0 = arith.constant 0 : index
    %c0_0 = arith.constant 0 : index
    %c0_1 = arith.constant 0 : index
    %0 = vector.load %arg5[%c0, %c0_0, %c0_1] : memref<1x8x1xf32, #tpu.memory_space<vmem>>, vector<1x8x1xf32>
    %1 = vector.shape_cast %0 : vector<1x8x1xf32> to vector<8x1xf32>
    %c0_2 = arith.constant 0 : index
    %c0_3 = arith.constant 0 : index
    %c0_4 = arith.constant 0 : index
    %2 = vector.load %arg6[%c0_2, %c0_3, %c0_4] : memref<1x1x8xf32, #tpu.memory_space<vmem>>, vector<1x1x8xf32>
    %3 = vector.shape_cast %2 : vector<1x1x8xf32> to vector<1x8xf32>
    %4 = vector.broadcast %1 : vector<8x1xf32> to vector<8x8xf32>
    %5 = vector.broadcast %3 : vector<1x8xf32> to vector<8x8xf32>
    %6 = arith.subf %4, %5 : vector<8x8xf32>
    %7 = arith.mulf %6, %6 : vector<8x8xf32>
    %cst = arith.constant 9.99999968E-21 : f32
    %8 = vector.broadcast %cst : f32 to vector<8x8xf32>
    %9 = arith.maximumf %7, %8 : vector<8x8xf32>
    %10 = arith.index_cast %arg1 : i32 to index
    %11 = memref.load %arg4[%10] : memref<3xf32, #tpu.memory_space<smem>>
    %12 = arith.index_cast %arg1 : i32 to index
    %13 = memref.load %arg3[%12] : memref<3xf32, #tpu.memory_space<smem>>
    %14 = vector.broadcast %13 : f32 to vector<8x8xf32>
    %15 = arith.mulf %14, %9 : vector<8x8xf32>
    %16 = math.exp %15 : vector<8x8xf32>
    %17 = vector.broadcast %11 : f32 to vector<8x8xf32>
    %18 = arith.mulf %17, %16 : vector<8x8xf32>
    %c0_5 = arith.constant 0 : index
    %c0_6 = arith.constant 0 : index
    %c0_7 = arith.constant 0 : index
    %19 = vector.load %arg7[%c0_5, %c0_6, %c0_7] : memref<1x8x8xf32, #tpu.memory_space<vmem>>, vector<1x8x8xf32>
    %20 = vector.shape_cast %19 : vector<1x8x8xf32> to vector<8x8xf32>
    %21 = vector.shape_cast %18 : vector<8x8xf32> to vector<1x8x8xf32>
    tpu.vector_store %arg7[%c0_5, %c0_6, %c0_7], %21 {strides = array<i32>} : memref<1x8x8xf32, #tpu.memory_space<vmem>>, vector<1x8x8xf32>,
    return
  }
  func.func @transform_0(%arg0: i32, %arg1: i32, %arg2: i32) -> i32 {
    %c0_i32 = arith.constant 0 : i32
    %c0_i32_0 = arith.constant 0 : i32
    return %c0_i32 : i32
  }
  func.func @transform_1(%arg0: i32, %arg1: i32, %arg2: i32) -> i32 {
    %c0_i32 = arith.constant 0 : i32
    %c0_i32_0 = arith.constant 0 : i32
    return %c0_i32 : i32
  }
  func.func @transform_2(%arg0: i32, %arg1: i32, %arg2: i32) -> (i32, i32, i32) {
    %c0_i32 = arith.constant 0 : i32
    %c0_i32_0 = arith.constant 0 : i32
    return %arg1, %arg2, %c0_i32 : i32, i32, i32
  }
  func.func @transform_3(%arg0: i32, %arg1: i32, %arg2: i32) -> (i32, i32, i32) {
    %c0_i32 = arith.constant 0 : i32
    %c0_i32_0 = arith.constant 0 : i32
    return %arg1, %c0_i32, %arg0 : i32, i32, i32
  }
  func.func @transform_4(%arg0: i32, %arg1: i32, %arg2: i32) -> (i32, i32, i32) {
    %c0_i32 = arith.constant 0 : i32
    return %arg1, %arg2, %arg0 : i32, i32, i32
  }
}

</mosaic_0001>

<bundles_post_ra>
// kernel: tpu_custom_call.1
= control target key start
LH: loop header
LB: loop body
LE: loop exit
PB: predicated region body
PF: predicated region fallthrough
CT: control target
= control target key end

     0   :  { %9 = vsyncpa [#allocation4], 0  ;;  %s828_s0 = inlined_call_operand.vmem [shape: f32[3], index: 0, kind: input, shape index: {}]   ;;  %s829_s1 = inlined_call_operand.vmem [shape: f32[3], index: 1, kind: input, shape index: {}]   ;;  %s830_s2 = inlined_call_operand.vmem [shape: f32[3,8,1], index: 2, kind: input, shape index: {}]   ;;  %s831_s3 = inlined_call_operand.vmem [shape: f32[3,1,8], index: 3, kind: input, shape index: {}]   ;;  %s832_s4 = inlined_call_operand.hbm [shape: f32[3,8,8], index: 4, kind: output, shape index: {}]  }
   0x1   :  { %10 = vsyncpa [#allocation6], 0 }
   0x2   :  { %11 = vsyncpa [#allocation3], 0 }
   0x3   :  { %13 = vsyncpa [#allocation3 + $0x1], 0  ;;  %s673_s15 = smov 0   ;;  %s675_s16 = smov 0  }
   0x4   :  { %s677_s17 = smov 0   ;;  %s679_s18 = smov 0  }
   0x5   :  { %s681_s19 = smov 0   ;;  %s683_s20 = smov 0  }
   0x6 LB: > { %s430_s21 = sadd.s32 4294967295, %s642_s20   ;;  %s431_s22 = sadd.s32 4294967294, %s642_s20   ;;  %s642_s20 = sphi %s683_s20, %s19_s20   ;;  %s638_s19 = sphi %s681_s19, %s850_s19   ;;  %s634_s18 = sphi %s679_s18, %s849_s18   ;;  %s630_s17 = sphi %s677_s17, %s848_s17   ;;  %s626_s16 = sphi %s675_s16, %s847_s16   ;;  %s622_s15 = sphi %s673_s15, %s846_s15  }
   0x7   : > { %s34_s23 = sadd.s32 1, %s638_s19  ;;  %s147_s24 = sadd.s32 1, %s630_s17 }
   0x8   : > { %p36_p0 = scmp.ge.s32.totalorder %s34_s23, 3  ;;  %p157_p1 = scmp.ne.s32.totalorder %s630_s17, %s626_s16 }
   0x9   : > { %p158_p2 = scmp.eq.s32.totalorder %s430_s21, 2  ;;  %p163_p3 = scmp.ne.s32.totalorder %s626_s16, %s622_s15 }
   0xa   : > { %s852_s23 = smov (%p36_p0, %s34_s23), 0  ;;  %p164_p5 = scmp.eq.s32.totalorder %s431_s22, 2 }
   0xb   : > { %p713_p4 = por %p158_p2, %p157_p1  ;;  %s140_s26 = ssub.s32 %s638_s19, %s852_s23 }
   0xc   : > { %p432_p6 = scmp.ge.s32.totalorder %s642_s20, 1  ;;  %p145_p7 = scmp.eq.s32.totalorder %s140_s26, 0 }
   0xd   : > { %s837_s25 = scalar_select %p713_p4, 1, 0 }
   0xe   : > { %p720_p8 = por %p164_p5, %p163_p3  ;;  %p171_p9 = scmp.lt.s32.totalorder %s642_s20, 4 }
   0xf   : > { %s726_s28 = scalar_select %p145_p7, %s630_s17, %s147_s24  }
  0x10   : > { %s838_s27 = scalar_select %p720_p8, 1, 0 }
  0x11   : > { %p728_p10 = pnand %p432_p6, %p171_p9  ;;  %p732_p11 = scmp.eq.s32.totalorder %s430_s21, 0 }
  0x12   : > { %s184_s7 = sshll.u32 %s828_s0, 4  ;;  %s195_s10 = sshll.u32 %s829_s1, 4  ;;  %s185_s7 = int_to_ptr.vmem [resolvable:$true] %s184_s7  ;;  %s196_s10 = int_to_ptr.vmem [resolvable:$true] %s195_s10 }
  0x13   : > { %s839_s29 = scalar_select %p728_p10, 1, 0 }
  0x14   : > { %s840_s30 = scalar_select %p732_p11, 1, 0 }
  0x15   : > { %p456_p12 = pneg %p728_p10  ;;  %s526_s12 = scalar_lea.vmem %s185_s7, 16 }
  0x16   : > { %p527_p0 = scmp.ne.s32.totalorder %s185_s7, %s526_s12  ;;  %p534_p5 = scmp.lt.s32.totalorder %s185_s7, %s185_s7 }
  0x17   : > { %p746_p13 = pnand %p732_p11, %p456_p12  ;;  %p535_p6 = scmp.lt.s32.totalorder %s526_s12, %s526_s12 }
  0x19   : > { %p528_p1 = pneg %p746_p13  ;;  %p536_p7 = por %p535_p6, %p534_p5 }
  0x1b   : > { %p529_p2 = pnand %p528_p1, %p527_p0 }
  0x1d   : > { %p530_p3 = pneg %p529_p2 }
  0x1f   : > { %p537_p9 = pnand %p536_p7, %p530_p3 }
  0x21   : > { %540 = shalt.err (!%p537_p9)
}
  0x22   : > { %s644_s13 = smov [#allocation2]   ;;  %s541_s14 = scalar_lea.vmem %s196_s10, 16 }
  0x23   : > { %459 = dma.vmem_to_smem (!%p746_p13), %s185_s7, 16, %s644_s13, [#allocation4]  }
  0x24   : > { %p542_p12 = scmp.ne.s32.totalorder %s196_s10, %s541_s14  ;;  %p549_p11 = scmp.lt.s32.totalorder %s196_s10, %s196_s10 }
  0x25   : > { %p550_p10 = scmp.lt.s32.totalorder %s541_s14, %s541_s14 }
  0x26   : > { %p544_p8 = pnand %p542_p12, %p528_p1 }
  0x27   : > { %p551_p0 = por %p550_p10, %p549_p11 }
  0x28   : > { %p545_p4 = pneg %p544_p8 }
  0x2a   : > { %p552_p2 = pnand %p551_p0, %p545_p4 }
  0x2c   : > { %555 = shalt.err (!%p552_p2)
}
  0x2d   : > { %s645_s21 = smov [#allocation5]   ;;  %p842_p3 = scmp.ne.s32.totalorder %s839_s29, 0 }
  0x2e   : > { %462 = dma.vmem_to_smem (!%p746_p13), %s196_s10, 16, %s645_s21, [#allocation6]  }
  0x2f   : > { %227 = sbr.rel (%p842_p3) target bundleno = 231 (0xe7), region = 36  ;;  %p843_p5 = scmp.ne.s32.totalorder (!%p842_p3), %s840_s30, 0 }
  0x36   : > { %609 = dma.done.wait (%p843_p5), [#allocation4], 16  }
  0x37   : > { %611 = vsyncadd (%p843_p5), [#allocation4], 4294967280 }
  0x38   : > { %613 = dma.done.wait (%p843_p5), [#allocation6], 16  }
  0x39   : > { %615 = vsyncadd (%p843_p5), [#allocation6], 4294967280 }
  0x3a   : > { %237 = sfence }
  0x3b   : > { %p266_p4 = scmp.lt.s32.totalorder %s634_s18, 2  ;;  %v646_v0 = vmov 0   ;;  %s296_s8 = sld [smem:[#allocation2 + %s634_s18]]  ;;  %vm303_vm0 = vcmask 64512  }
  0x3c   : > { %523 = vset.pattern.permute.xlu0 %v646_v0  ;;  %s263_s9 = sand.u32 1, %s626_s16   ;;  %s295_s10 = sld [smem:[#allocation5 + %s634_s18]] }
  0x3d   : > { %s267_s22 = scalar_select %p266_p4, %s634_s18, 2 }
  0x3e   : > { %s439_s11 = sshll.u32 %s263_s9, 3  ;;  %s443_s12 = sshll.u32 %s634_s18, 7 }
  0x3f   : > { %s440_s24 = sshll.u32 %s267_s22, 3  ;;  %s278_s7 = scalar_lea.vmem %s831_s3, %s267_s22 }
  0x40   : > { %s272_s5 = scalar_lea.vmem %s830_s2, %s440_s24  ;;  %v441_v2 = vld [vmem:[%s278_s7] ss:$0 sm:$0xff]  ;;  %s265_s13 = scalar_lea.vmem [#allocation7], %s439_s11 }
  0x41   : > { %v279_v1 = vld [vmem:[%s272_s5] sm:$0xff]  ;;  %v297_v6 = vstv %s296_s8  ;;  %s321_s14 = sshll.u32 %s265_s13, 4  ;;  %s781_s24 = scalar_lea.hbm %s832_s4, %s443_s12  ;;  %s783_s14 = int_to_ptr.vmem [resolvable:$true] %s321_s14 }
  0x42   : > { %283 = vperm.xlu0 %523, %v279_v1   ;;  %v301_v10 = vstv %s295_s10  ;;  %s306_s26 = scalar_lea.sflag [#allocation3], %s263_s9  ;;  %s556_s29 = scalar_lea.vmem %s783_s14, 128 }
  0x43   : > { %p557_p8 = scmp.ne.s32.totalorder %s783_s14, %s556_s29  ;;  %p844_p10 = scmp.ne.s32.totalorder %s837_s25, 0 }
  0x44   : > { %s647_s18 = smov [#allocation7]  }
  0x45   : > { %p558_p11 = pnand %p557_p8, %p844_p10  ;;  %s560_s5 = sshll.u32 %s647_s18, 4  ;;  %s561_s5 = int_to_ptr.vmem [resolvable:$false] %s560_s5 }
  0x46   : > { %s562_s6 = scalar_lea.vmem %s561_s5, 256  ;;  %p563_p1 = scmp.lt.s32.totalorder %s783_s14, %s561_s5 }
  0x47   : > { %p559_p13 = pneg %p558_p11  ;;  %p564_p6 = scmp.lt.s32.totalorder %s562_s6, %s556_s29 }
  0x49   : > { %p565_p7 = por %p564_p6, %p563_p1 }
  0x4b   : > { %p566_p9 = pnand %p565_p7, %p559_p13 }
  0xc1   : > { %v284_v3 = vpop.permute.xlu0 %283 }
  0xc2   : > { %v292_v4 = vsub.f32 %v284_v3, %v441_v2 }
  0xc4   : > { %v293_v5 = vmul.f32 %v292_v4, %v292_v4 }
  0xc6   : > { %v294_v7 = vmax.f32 %v293_v5, 1e-20 }
  0xc8   : > { %v298_v8 = vmul.f32 %v297_v6, %v294_v7 }
  0xca   : > { %v299_v9 = vmul.f32 1.442695, %v298_v8 }
  0xcc   : > { %524 = vpow2.f32 %v299_v9 }
  0xd6   : > { %v525_v11 = vpop.eup %524 }
  0xd7   : > { %v302_v12 = vmul.f32 %v525_v11, %v301_v10 }
  0xd9   : > { %304 = vst.msk [vmem:[%s265_s13] sm:$0xff] %vm303_vm0, %v302_v12 }
  0xda   : > { %569 = shalt.err (!%p566_p9)
}
  0xdb   : > { %s570_s30 = scalar_lea.hbm %s781_s24, 128  ;;  %s574_s9 = scalar_lea.hbm %s832_s4, 384 }
  0xdc   : > { %p571_p12 = scmp.ne.s32.totalorder %s781_s24, %s570_s30  ;;  %p575_p3 = scmp.lt.u32.totalorder %s781_s24, %s832_s4 }
  0xdd   : > { %p576_p5 = scmp.lt.u32.totalorder %s574_s9, %s570_s30  ;;  %p578_p8 = scmp.lt.u32.totalorder %s570_s30, %s781_s24 }
  0xde   : > { %p572_p0 = pnand %p571_p12, %p844_p10 }
  0xdf   : > { %p577_p4 = por %p576_p5, %p575_p3 }
  0xe0   : > { %p573_p2 = pneg %p572_p0 }
  0xe1   : > { %p579_p11 = por %p578_p8, %p577_p4 }
  0xe3   : > { %p580_p13 = pnand %p579_p11, %p573_p2 }
  0xe5   : > { %583 = shalt.err (!%p580_p13)
}
  0xe6   : > { %454 = dma.vmem_to_hbm [thread:$0]  (%p844_p10), %s783_s14, 128, %s781_s24, %s306_s26  }
  0xe7 PF: > { %p471_p1 = scmp.ge.s32.totalorder %s642_s20, 2  ;;  %s333_s12 = sand.u32 1, %s622_s15  }
  0xe8   : > { %p845_p6 = scmp.ne.s32.totalorder %s838_s27, 0  ;;  %s334_s13 = scalar_lea.sflag [#allocation3], %s333_s12 }
  0xea   : > { %p464_p7 = pnand %p471_p1, %p845_p6 }
  0xec   : > { %617 = dma.done.wait (!%p464_p7), %s334_s13, 128  }
  0xed   : > { %619 = vsyncadd (!%p464_p7), %s334_s13, 4294967168  ;;  %s19_s20 = sadd.s32 1, %s642_s20   ;;  %s846_s15 = smov %s626_s16 }
  0xee   : > { %p16_p9 = scmp.ge.s32.totalorder %s19_s20, 5   ;;  %s847_s16 = smov %s630_s17 }
  0xef   : > { %s848_s17 = smov %s726_s28  ;;  %s849_s18 = smov %s638_s19 }
  0xf0   : > { %s850_s19 = smov %s852_s23  ;;  %18 = sbr.rel (!%p16_p9) target bundleno = 6 (0x6), region = 83 }
  0xf7   :  { %339 = vsyncpa [#allocation3], 1 }
  0xf8   :  { %341 = vsyncpa [#allocation3 + $0x1], 1 }
  0xf9   :  { %342 = vsyncpa [#allocation4], 1 }
  0xfa   :  { %344 = vsyncpa [#allocation4 + $0x1], 1 }
  0xfb   :  { %345 = vsyncpa [#allocation6], 1 }

</bundles_post_ra>
